<compile_context>
chip_gen: v7x
topology: tpu7x:2x2x1
jax: 0.10.0
libtpu: 0.0.40
codegen_flags: <defaults>
</compile_context>

<pallas_src>
import math
import numpy as np
import jax
import jax.numpy as jnp
from jax.experimental import pallas as pl
from jax.experimental.pallas import tpu as pltpu

# ------------------------- model dims (small, deterministic) ----------------
S = 8          # sequence length
B = 2          # batch
E = 32         # hidden_dim
H = 4          # nhead
DH = E // H    # head dim
FF = 64        # dim_feedforward (== 2*E, used for the packed-vector layout)
SB = S * B     # total tokens
EPS = 1e-5     # nn.LayerNorm default eps
NEG = -1e30    # mask bias for cross-batch attention pairs


# ------------------------------ Pallas kernel -------------------------------
def _encoder_layer_kernel(src_ref, pos_ref, bias_ref,
                          wqk_ref, wv_ref, wo_ref, w1_ref, w2_ref,
                          vecs_ref, out_ref):
    # Whole problem in one step: src/pos are the flat token slab (SB, E),
    # rows ordered seq-major (row = s*B + b).
    src = src_ref[...].astype(jnp.float32)          # (SB, E)
    pos = pos_ref[...].astype(jnp.float32)          # (SB, E)
    bias = bias_ref[...]                            # (SB, SB) block-diag 0 / -1e30
    vecs = vecs_ref[...]                            # (8, 2E) packed small vectors

    b_qk = vecs[0:1, :]        # (1, 2E)  [bq | bk]
    b_1  = vecs[1:2, :]        # (1, FF)
    b_v  = vecs[2:3, :E]       # (1, E)
    b_o  = vecs[2:3, E:]       # (1, E)
    b_2  = vecs[3:4, :E]
    g_1  = vecs[3:4, E:]
    be_1 = vecs[4:5, :E]
    g_2  = vecs[4:5, E:]
    be_2 = vecs[5:6, :E]

    # fused Q/K projection from with_pos_embed(src, pos); V from src
    qk_in = src + pos
    qk = jnp.dot(qk_in, wqk_ref[...], preferred_element_type=jnp.float32) + b_qk  # (SB, 2E)
    v  = jnp.dot(src,   wv_ref[...], preferred_element_type=jnp.float32) + b_v    # (SB, E)

    scale = 1.0 / math.sqrt(DH)
    wo = wo_ref[...]                                 # (E, E) = out_proj.weight.T

    # multi-head attention over the full slab; cross-batch pairs masked out.
    # Head h output is folded straight through rows [h*DH:(h+1)*DH] of W_o and
    # accumulated (no lane-axis concatenate).  Static unroll, H = 4.
    attn = jnp.zeros((SB, E), jnp.float32)
    for h in range(H):
        sl = slice(h * DH, (h + 1) * DH)
        qh = qk[:, sl]                               # (SB, DH)
        kh = qk[:, E + h * DH:E + (h + 1) * DH]      # (SB, DH)
        vh = v[:, sl]                                # (SB, DH)
        s = jax.lax.dot_general(qh, kh, (((1,), (1,)), ((), ())),
                                preferred_element_type=jnp.float32)            # (SB, SB)
        s = s * scale + bias
        s = s - jnp.max(s, axis=-1, keepdims=True)
        p = jnp.exp(s)
        p = p / jnp.sum(p, axis=-1, keepdims=True)
        oh = jnp.dot(p, vh, preferred_element_type=jnp.float32)                # (SB, DH)
        attn = attn + jnp.dot(oh, wo[sl, :], preferred_element_type=jnp.float32)
    attn = attn + b_o

    # residual + LayerNorm1   (dropout1 is identity in eval mode)
    x = src + attn
    mu = jnp.mean(x, axis=-1, keepdims=True)
    var = jnp.mean((x - mu) ** 2, axis=-1, keepdims=True)
    x = (x - mu) * jax.lax.rsqrt(var + EPS) * g_1 + be_1

    # feed-forward: linear2(relu(linear1(x)))   (inner dropout is identity)
    h1 = jnp.dot(x, w1_ref[...], preferred_element_type=jnp.float32) + b_1
    h1 = jnp.maximum(h1, 0.0)
    ff = jnp.dot(h1, w2_ref[...], preferred_element_type=jnp.float32) + b_2

    # residual + LayerNorm2   (dropout2 is identity in eval mode)
    y = x + ff
    mu2 = jnp.mean(y, axis=-1, keepdims=True)
    var2 = jnp.mean((y - mu2) ** 2, axis=-1, keepdims=True)
    y = (y - mu2) * jax.lax.rsqrt(var2 + EPS) * g_2 + be_2

    out_ref[...] = y.astype(out_ref.dtype)


# ----------------------- one-time parameter packing --------------------------
def pack_params(params):
    """Pre-transpose / fuse / pack all parameters once (hoisted out of the call)."""
    in_w, in_b = params["in_proj_w"], params["in_proj_b"]
    wq, wk, wv = in_w[:E], in_w[E:2 * E], in_w[2 * E:]
    bq, bk, bv = in_b[:E], in_b[E:2 * E], in_b[2 * E:]

    wqk = jnp.concatenate([wq.T, wk.T], axis=1)      # (E, 2E)
    wv_t = wv.T                                      # (E, E)
    wo = params["out_proj_w"].T                      # (E, E)
    w1 = params["linear1_w"].T                       # (E, FF)
    w2 = params["linear2_w"].T                       # (FF, E)

    zeros_e = jnp.zeros((E,), jnp.float32)
    zeros_r = jnp.zeros((2 * E,), jnp.float32)
    # All small (1, E)/(1, FF) vectors packed into one (8, 2E) array (FF == 2E).
    vecs = jnp.stack([
        jnp.concatenate([bq, bk]),                              # row 0: b_qk
        params["linear1_b"],                                    # row 1: b_1
        jnp.concatenate([bv, params["out_proj_b"]]),            # row 2: b_v | b_o
        jnp.concatenate([params["linear2_b"], params["norm1_g"]]),   # row 3: b_2 | g_1
        jnp.concatenate([params["norm1_b"], params["norm2_g"]]),     # row 4: be_1 | g_2
        jnp.concatenate([params["norm2_b"], zeros_e]),               # row 5: be_2 | -
        zeros_r, zeros_r,                                       # pad to 8 rows
    ]).astype(jnp.float32)                                      # (8, 2E)

    # Block-diagonal attention bias for the flat seq-major token slab:
    # row r = s*B + b  ->  same batch element iff r % B matches.
    r = np.arange(SB)
    same = (r[:, None] % B) == (r[None, :] % B)
    attn_bias = jnp.asarray(np.where(same, 0.0, NEG), dtype=jnp.float32)  # (SB, SB)

    return {"wqk": wqk, "wv": wv_t, "wo": wo, "w1": w1, "w2": w2,
            "vecs": vecs, "attn_bias": attn_bias}


# --------------------------------- wrapper -----------------------------------
def transformer_encoder_layer(src_sbe, pos_sbe, packed):
    """src_sbe, pos_sbe: (S, B, E) float32 (PyTorch MHA seq-major convention)."""
    # Free, contiguous view: (S, B, E) -> (S*B, E); no transpose, no copy.
    src2d = src_sbe.reshape(SB, E)
    pos2d = pos_sbe.reshape(SB, E)

    def full(shape):
        return pl.BlockSpec(shape, lambda i, _s=shape: (0,) * len(_s))

    out = pl.pallas_call(
        _encoder_layer_kernel,
        out_shape=jax.ShapeDtypeStruct((SB, E), jnp.float32),
        grid=(1,),                                   # single step: whole problem fits VMEM
        in_specs=[
            full((SB, E)), full((SB, E)),            # src, pos (flat token slab)
            full((SB, SB)),                          # block-diagonal attention bias
            full((E, 2 * E)),                        # fused [Wq | Wk]
            full((E, E)), full((E, E)),              # Wv, Wo
            full((E, FF)), full((FF, E)),            # linear1, linear2
            full((8, 2 * E)),                        # packed biases / layernorm params
        ],
        out_specs=full((SB, E)),
        compiler_params=pltpu.CompilerParams(
            dimension_semantics=("arbitrary",),
            vmem_limit_bytes=16 << 20,
        ),
    )(src2d, pos2d, packed["attn_bias"], packed["wqk"], packed["wv"],
      packed["wo"], packed["w1"], packed["w2"], packed["vecs"])

    return out.reshape(S, B, E)                      # free view back to (S, B, E)


# ------------------------------ pure-JAX reference ---------------------------
def _reference(src_sbe, pos_sbe, params):
    def layernorm(x, g, b):
        mu = jnp.mean(x, -1, keepdims=True)
        var = jnp.mean((x - mu) ** 2, -1, keepdims=True)
        return (x - mu) / jnp.sqrt(var + EPS) * g + b

    src = jnp.transpose(src_sbe, (1, 0, 2))
    pos = jnp.transpose(pos_sbe, (1, 0, 2))
    in_w, in_b = params["in_proj_w"], params["in_proj_b"]
    qk_in = src + pos
    q = qk_in @ in_w[:E].T + in_b[:E]
    k = qk_in @ in_w[E:2 * E].T + in_b[E:2 * E]
    v = src @ in_w[2 * E:].T + in_b[2 * E:]

    def heads(x):  # (B, S, E) -> (B, H, S, DH)
        return jnp.transpose(x.reshape(B, S, H, DH), (0, 2, 1, 3))

    qh, kh, vh = heads(q), heads(k), heads(v)
    scores = jnp.einsum("bhqd,bhkd->bhqk", qh, kh) / math.sqrt(DH)
    p = jax.nn.softmax(scores, axis=-1)
    o = jnp.einsum("bhqk,bhkd->bhqd", p, vh)
    o = jnp.transpose(o, (0, 2, 1, 3)).reshape(B, S, E)
    attn = o @ params["out_proj_w"].T + params["out_proj_b"]

    x = layernorm(src + attn, params["norm1_g"], params["norm1_b"])
    ff = jnp.maximum(x @ params["linear1_w"].T + params["linear1_b"], 0.0)
    ff = ff @ params["linear2_w"].T + params["linear2_b"]
    y = layernorm(x + ff, params["norm2_g"], params["norm2_b"])
    return jnp.transpose(y, (1, 0, 2))


# ------------------------------------ main -----------------------------------
if __name__ == "__main__":
    key = jax.random.PRNGKey(0)
    ks = jax.random.split(key, 12)

    scale = 0.1
    params = {
        "in_proj_w":  scale * jax.random.normal(ks[0], (3 * E, E), jnp.float32),
        "in_proj_b":  scale * jax.random.normal(ks[1], (3 * E,), jnp.float32),
        "out_proj_w": scale * jax.random.normal(ks[2], (E, E), jnp.float32),
        "out_proj_b": scale * jax.random.normal(ks[3], (E,), jnp.float32),
        "linear1_w":  scale * jax.random.normal(ks[4], (FF, E), jnp.float32),
        "linear1_b":  scale * jax.random.normal(ks[5], (FF,), jnp.float32),
        "linear2_w":  scale * jax.random.normal(ks[6], (E, FF), jnp.float32),
        "linear2_b":  scale * jax.random.normal(ks[7], (E,), jnp.float32),
        "norm1_g":    jnp.ones((E,), jnp.float32),
        "norm1_b":    jnp.zeros((E,), jnp.float32),
        "norm2_g":    jnp.ones((E,), jnp.float32),
        "norm2_b":    jnp.zeros((E,), jnp.float32),
    }

    src = jax.random.normal(ks[8], (S, B, E), jnp.float32)   # (seq, batch, hidden)
    pos = jax.random.normal(ks[9], (S, B, E), jnp.float32)

    packed = pack_params(params)                    # hoisted one-time packing
    packed = jax.tree_util.tree_map(jax.block_until_ready, packed)

    out = transformer_encoder_layer(src, pos, packed)
    out = jax.block_until_ready(out)

    ref = _reference(src, pos, params)
    np.testing.assert_allclose(np.asarray(out), np.asarray(ref), atol=1e-4, rtol=1e-4)

    print("KERNEL_OK")
</pallas_src>

<mosaic_0001>
module attributes {stable_mosaic.version = 11 : i64} {
  func.func @_encoder_layer_kernel(%arg0: i32, %arg1: memref<16x32xf32, #tpu.memory_space<vmem>>, %arg2: memref<16x32xf32, #tpu.memory_space<vmem>>, %arg3: memref<16x16xf32, #tpu.memory_space<vmem>>, %arg4: memref<32x64xf32, #tpu.memory_space<vmem>>, %arg5: memref<32x32xf32, #tpu.memory_space<vmem>>, %arg6: memref<32x32xf32, #tpu.memory_space<vmem>>, %arg7: memref<32x64xf32, #tpu.memory_space<vmem>>, %arg8: memref<64x32xf32, #tpu.memory_space<vmem>>, %arg9: memref<8x64xf32, #tpu.memory_space<vmem>>, %arg10: memref<16x32xf32, #tpu.memory_space<vmem>>) attributes {dimension_semantics = [#tpu.dimension_semantics<arbitrary>], iteration_bounds = array<i64: 1>, scalar_prefetch = 0 : i64, scratch_operands = 0 : i64, tpu.core_type = #tpu.core_type<tc>, window_params = [{pipeline_mode = #tpu.pipeline_mode<synchronous>, transform_indices = @transform_0, window_bounds = array<i64: 16, 32>}, {pipeline_mode = #tpu.pipeline_mode<synchronous>, transform_indices = @transform_1, window_bounds = array<i64: 16, 32>}, {pipeline_mode = #tpu.pipeline_mode<synchronous>, transform_indices = @transform_2, window_bounds = array<i64: 16, 16>}, {pipeline_mode = #tpu.pipeline_mode<synchronous>, transform_indices = @transform_3, window_bounds = array<i64: 32, 64>}, {pipeline_mode = #tpu.pipeline_mode<synchronous>, transform_indices = @transform_4, window_bounds = array<i64: 32, 32>}, {pipeline_mode = #tpu.pipeline_mode<synchronous>, transform_indices = @transform_5, window_bounds = array<i64: 32, 32>}, {pipeline_mode = #tpu.pipeline_mode<synchronous>, transform_indices = @transform_6, window_bounds = array<i64: 32, 64>}, {pipeline_mode = #tpu.pipeline_mode<synchronous>, transform_indices = @transform_7, window_bounds = array<i64: 64, 32>}, {pipeline_mode = #tpu.pipeline_mode<synchronous>, transform_indices = @transform_8, window_bounds = array<i64: 8, 64>}, {pipeline_mode = #tpu.pipeline_mode<synchronous>, transform_indices = @transform_9, window_bounds = array<i64: 16, 32>}]} {
    %c0 = arith.constant 0 : index
    %c0_0 = arith.constant 0 : index
    %0 = vector.load %arg1[%c0, %c0_0] : memref<16x32xf32, #tpu.memory_space<vmem>>, vector<16x32xf32>
    %c0_1 = arith.constant 0 : index
    %c0_2 = arith.constant 0 : index
    %1 = vector.load %arg2[%c0_1, %c0_2] : memref<16x32xf32, #tpu.memory_space<vmem>>, vector<16x32xf32>
    %c0_3 = arith.constant 0 : index
    %c0_4 = arith.constant 0 : index
    %2 = vector.load %arg3[%c0_3, %c0_4] : memref<16x16xf32, #tpu.memory_space<vmem>>, vector<16x16xf32>
    %c0_5 = arith.constant 0 : index
    %c0_6 = arith.constant 0 : index
    %3 = vector.load %arg9[%c0_5, %c0_6] : memref<8x64xf32, #tpu.memory_space<vmem>>, vector<8x64xf32>
    %4 = vector.extract_strided_slice %3 {offsets = [0, 0], sizes = [1, 64], strides = [1, 1]} : vector<8x64xf32> to vector<1x64xf32>
    %5 = vector.extract_strided_slice %3 {offsets = [1, 0], sizes = [1, 64], strides = [1, 1]} : vector<8x64xf32> to vector<1x64xf32>
    %6 = vector.extract_strided_slice %3 {offsets = [2, 0], sizes = [1, 32], strides = [1, 1]} : vector<8x64xf32> to vector<1x32xf32>
    %7 = vector.extract_strided_slice %3 {offsets = [2, 32], sizes = [1, 32], strides = [1, 1]} : vector<8x64xf32> to vector<1x32xf32>
    %8 = vector.extract_strided_slice %3 {offsets = [3, 0], sizes = [1, 32], strides = [1, 1]} : vector<8x64xf32> to vector<1x32xf32>
    %9 = vector.extract_strided_slice %3 {offsets = [3, 32], sizes = [1, 32], strides = [1, 1]} : vector<8x64xf32> to vector<1x32xf32>
    %10 = vector.extract_strided_slice %3 {offsets = [4, 0], sizes = [1, 32], strides = [1, 1]} : vector<8x64xf32> to vector<1x32xf32>
    %11 = vector.extract_strided_slice %3 {offsets = [4, 32], sizes = [1, 32], strides = [1, 1]} : vector<8x64xf32> to vector<1x32xf32>
    %12 = vector.extract_strided_slice %3 {offsets = [5, 0], sizes = [1, 32], strides = [1, 1]} : vector<8x64xf32> to vector<1x32xf32>
    %13 = arith.addf %0, %1 : vector<16x32xf32>
    %c0_7 = arith.constant 0 : index
    %c0_8 = arith.constant 0 : index
    %14 = vector.load %arg4[%c0_7, %c0_8] : memref<32x64xf32, #tpu.memory_space<vmem>>, vector<32x64xf32>
    %cst = arith.constant dense<0.000000e+00> : vector<16x64xf32>
    %15 = tpu.matmul %13, %14, %cst {dimension_numbers = #tpu.dot_dimension_numbers<[1], [0], [0], [1], [0, 0, 1, 1], [], []>} : vector<16x32xf32>, vector<32x64xf32>, vector<16x64xf32> -> vector<16x64xf32>
    %16 = vector.broadcast %4 : vector<1x64xf32> to vector<16x64xf32>
    %17 = arith.addf %15, %16 : vector<16x64xf32>
    %c0_9 = arith.constant 0 : index
    %c0_10 = arith.constant 0 : index
    %18 = vector.load %arg5[%c0_9, %c0_10] : memref<32x32xf32, #tpu.memory_space<vmem>>, vector<32x32xf32>
    %cst_11 = arith.constant dense<0.000000e+00> : vector<16x32xf32>
    %19 = tpu.matmul %0, %18, %cst_11 {dimension_numbers = #tpu.dot_dimension_numbers<[1], [0], [0], [1], [0, 0, 1, 1], [], []>} : vector<16x32xf32>, vector<32x32xf32>, vector<16x32xf32> -> vector<16x32xf32>
    %20 = vector.broadcast %6 : vector<1x32xf32> to vector<16x32xf32>
    %21 = arith.addf %19, %20 : vector<16x32xf32>
    %c0_12 = arith.constant 0 : index
    %c0_13 = arith.constant 0 : index
    %22 = vector.load %arg6[%c0_12, %c0_13] : memref<32x32xf32, #tpu.memory_space<vmem>>, vector<32x32xf32>
    %cst_14 = arith.constant 0.000000e+00 : f32
    %23 = vector.broadcast %cst_14 : f32 to vector<16x32xf32>
    %24 = vector.extract_strided_slice %17 {offsets = [0, 0], sizes = [16, 8], strides = [1, 1]} : vector<16x64xf32> to vector<16x8xf32>
    %25 = vector.extract_strided_slice %17 {offsets = [0, 32], sizes = [16, 8], strides = [1, 1]} : vector<16x64xf32> to vector<16x8xf32>
    %26 = vector.extract_strided_slice %21 {offsets = [0, 0], sizes = [16, 8], strides = [1, 1]} : vector<16x32xf32> to vector<16x8xf32>
    %cst_15 = arith.constant dense<0.000000e+00> : vector<16x16xf32>
    %27 = tpu.matmul %24, %25, %cst_15 {dimension_numbers = #tpu.dot_dimension_numbers<[1], [1], [0], [0], [0, 0, 1, 0], [], []>} : vector<16x8xf32>, vector<16x8xf32>, vector<16x16xf32> -> vector<16x16xf32>
    %cst_16 = arith.constant 0.353553385 : f32
    %28 = vector.broadcast %cst_16 : f32 to vector<16x16xf32>
    %29 = arith.mulf %27, %28 : vector<16x16xf32>
    %30 = arith.addf %29, %2 : vector<16x16xf32>
    %cst_17 = arith.constant dense<0xFF800000> : vector<16xf32>
    %31 = vector.multi_reduction <maximumf>, %30, %cst_17 [1] : vector<16x16xf32> to vector<16xf32>
    %32 = vector.shape_cast %31 : vector<16xf32> to vector<16x1xf32>
    %33 = vector.broadcast %32 : vector<16x1xf32> to vector<16x16xf32>
    %34 = arith.subf %30, %33 : vector<16x16xf32>
    %35 = math.exp %34 : vector<16x16xf32>
    %cst_18 = arith.constant dense<0.000000e+00> : vector<16xf32>
    %36 = vector.multi_reduction <add>, %35, %cst_18 [1] : vector<16x16xf32> to vector<16xf32>
    %37 = vector.shape_cast %36 : vector<16xf32> to vector<16x1xf32>
    %38 = vector.broadcast %37 : vector<16x1xf32> to vector<16x16xf32>
    %39 = arith.divf %35, %38 : vector<16x16xf32>
    %cst_19 = arith.constant dense<0.000000e+00> : vector<16x8xf32>
    %40 = tpu.matmul %39, %26, %cst_19 {dimension_numbers = #tpu.dot_dimension_numbers<[1], [0], [0], [1], [0, 0, 1, 1], [], []>} : vector<16x16xf32>, vector<16x8xf32>, vector<16x8xf32> -> vector<16x8xf32>
    %41 = vector.extract_strided_slice %22 {offsets = [0, 0], sizes = [8, 32], strides = [1, 1]} : vector<32x32xf32> to vector<8x32xf32>
    %cst_20 = arith.constant dense<0.000000e+00> : vector<16x32xf32>
    %42 = tpu.matmul %40, %41, %cst_20 {dimension_numbers = #tpu.dot_dimension_numbers<[1], [0], [0], [1], [0, 0, 1, 1], [], []>} : vector<16x8xf32>, vector<8x32xf32>, vector<16x32xf32> -> vector<16x32xf32>
    %43 = arith.addf %23, %42 : vector<16x32xf32>
    %44 = vector.extract_strided_slice %17 {offsets = [0, 8], sizes = [16, 8], strides = [1, 1]} : vector<16x64xf32> to vector<16x8xf32>
    %45 = vector.extract_strided_slice %17 {offsets = [0, 40], sizes = [16, 8], strides = [1, 1]} : vector<16x64xf32> to vector<16x8xf32>
    %46 = vector.extract_strided_slice %21 {offsets = [0, 8], sizes = [16, 8], strides = [1, 1]} : vector<16x32xf32> to vector<16x8xf32>
    %cst_21 = arith.constant dense<0.000000e+00> : vector<16x16xf32>
    %47 = tpu.matmul %44, %45, %cst_21 {dimension_numbers = #tpu.dot_dimension_numbers<[1], [1], [0], [0], [0, 0, 1, 0], [], []>} : vector<16x8xf32>, vector<16x8xf32>, vector<16x16xf32> -> vector<16x16xf32>
    %cst_22 = arith.constant 0.353553385 : f32
    %48 = vector.broadcast %cst_22 : f32 to vector<16x16xf32>
    %49 = arith.mulf %47, %48 : vector<16x16xf32>
    %50 = arith.addf %49, %2 : vector<16x16xf32>
    %cst_23 = arith.constant dense<0xFF800000> : vector<16xf32>
    %51 = vector.multi_reduction <maximumf>, %50, %cst_23 [1] : vector<16x16xf32> to vector<16xf32>
    %52 = vector.shape_cast %51 : vector<16xf32> to vector<16x1xf32>
    %53 = vector.broadcast %52 : vector<16x1xf32> to vector<16x16xf32>
    %54 = arith.subf %50, %53 : vector<16x16xf32>
    %55 = math.exp %54 : vector<16x16xf32>
    %cst_24 = arith.constant dense<0.000000e+00> : vector<16xf32>
    %56 = vector.multi_reduction <add>, %55, %cst_24 [1] : vector<16x16xf32> to vector<16xf32>
    %57 = vector.shape_cast %56 : vector<16xf32> to vector<16x1xf32>
    %58 = vector.broadcast %57 : vector<16x1xf32> to vector<16x16xf32>
    %59 = arith.divf %55, %58 : vector<16x16xf32>
    %cst_25 = arith.constant dense<0.000000e+00> : vector<16x8xf32>
    %60 = tpu.matmul %59, %46, %cst_25 {dimension_numbers = #tpu.dot_dimension_numbers<[1], [0], [0], [1], [0, 0, 1, 1], [], []>} : vector<16x16xf32>, vector<16x8xf32>, vector<16x8xf32> -> vector<16x8xf32>
    %61 = vector.extract_strided_slice %22 {offsets = [8, 0], sizes = [8, 32], strides = [1, 1]} : vector<32x32xf32> to vector<8x32xf32>
    %cst_26 = arith.constant dense<0.000000e+00> : vector<16x32xf32>
    %62 = tpu.matmul %60, %61, %cst_26 {dimension_numbers = #tpu.dot_dimension_numbers<[1], [0], [0], [1], [0, 0, 1, 1], [], []>} : vector<16x8xf32>, vector<8x32xf32>, vector<16x32xf32> -> vector<16x32xf32>
    %63 = arith.addf %43, %62 : vector<16x32xf32>
    %64 = vector.extract_strided_slice %17 {offsets = [0, 16], sizes = [16, 8], strides = [1, 1]} : vector<16x64xf32> to vector<16x8xf32>
    %65 = vector.extract_strided_slice %17 {offsets = [0, 48], sizes = [16, 8], strides = [1, 1]} : vector<16x64xf32> to vector<16x8xf32>
    %66 = vector.extract_strided_slice %21 {offsets = [0, 16], sizes = [16, 8], strides = [1, 1]} : vector<16x32xf32> to vector<16x8xf32>
    %cst_27 = arith.constant dense<0.000000e+00> : vector<16x16xf32>
    %67 = tpu.matmul %64, %65, %cst_27 {dimension_numbers = #tpu.dot_dimension_numbers<[1], [1], [0], [0], [0, 0, 1, 0], [], []>} : vector<16x8xf32>, vector<16x8xf32>, vector<16x16xf32> -> vector<16x16xf32>
    %cst_28 = arith.constant 0.353553385 : f32
    %68 = vector.broadcast %cst_28 : f32 to vector<16x16xf32>
    %69 = arith.mulf %67, %68 : vector<16x16xf32>
    %70 = arith.addf %69, %2 : vector<16x16xf32>
    %cst_29 = arith.constant dense<0xFF800000> : vector<16xf32>
    %71 = vector.multi_reduction <maximumf>, %70, %cst_29 [1] : vector<16x16xf32> to vector<16xf32>
    %72 = vector.shape_cast %71 : vector<16xf32> to vector<16x1xf32>
    %73 = vector.broadcast %72 : vector<16x1xf32> to vector<16x16xf32>
    %74 = arith.subf %70, %73 : vector<16x16xf32>
    %75 = math.exp %74 : vector<16x16xf32>
    %cst_30 = arith.constant dense<0.000000e+00> : vector<16xf32>
    %76 = vector.multi_reduction <add>, %75, %cst_30 [1] : vector<16x16xf32> to vector<16xf32>
    %77 = vector.shape_cast %76 : vector<16xf32> to vector<16x1xf32>
    %78 = vector.broadcast %77 : vector<16x1xf32> to vector<16x16xf32>
    %79 = arith.divf %75, %78 : vector<16x16xf32>
    %cst_31 = arith.constant dense<0.000000e+00> : vector<16x8xf32>
    %80 = tpu.matmul %79, %66, %cst_31 {dimension_numbers = #tpu.dot_dimension_numbers<[1], [0], [0], [1], [0, 0, 1, 1], [], []>} : vector<16x16xf32>, vector<16x8xf32>, vector<16x8xf32> -> vector<16x8xf32>
    %81 = vector.extract_strided_slice %22 {offsets = [16, 0], sizes = [8, 32], strides = [1, 1]} : vector<32x32xf32> to vector<8x32xf32>
    %cst_32 = arith.constant dense<0.000000e+00> : vector<16x32xf32>
    %82 = tpu.matmul %80, %81, %cst_32 {dimension_numbers = #tpu.dot_dimension_numbers<[1], [0], [0], [1], [0, 0, 1, 1], [], []>} : vector<16x8xf32>, vector<8x32xf32>, vector<16x32xf32> -> vector<16x32xf32>
    %83 = arith.addf %63, %82 : vector<16x32xf32>
    %84 = vector.extract_strided_slice %17 {offsets = [0, 24], sizes = [16, 8], strides = [1, 1]} : vector<16x64xf32> to vector<16x8xf32>
    %85 = vector.extract_strided_slice %17 {offsets = [0, 56], sizes = [16, 8], strides = [1, 1]} : vector<16x64xf32> to vector<16x8xf32>
    %86 = vector.extract_strided_slice %21 {offsets = [0, 24], sizes = [16, 8], strides = [1, 1]} : vector<16x32xf32> to vector<16x8xf32>
    %cst_33 = arith.constant dense<0.000000e+00> : vector<16x16xf32>
    %87 = tpu.matmul %84, %85, %cst_33 {dimension_numbers = #tpu.dot_dimension_numbers<[1], [1], [0], [0], [0, 0, 1, 0], [], []>} : vector<16x8xf32>, vector<16x8xf32>, vector<16x16xf32> -> vector<16x16xf32>
    %cst_34 = arith.constant 0.353553385 : f32
    %88 = vector.broadcast %cst_34 : f32 to vector<16x16xf32>
    %89 = arith.mulf %87, %88 : vector<16x16xf32>
    %90 = arith.addf %89, %2 : vector<16x16xf32>
    %cst_35 = arith.constant dense<0xFF800000> : vector<16xf32>
    %91 = vector.multi_reduction <maximumf>, %90, %cst_35 [1] : vector<16x16xf32> to vector<16xf32>
    %92 = vector.shape_cast %91 : vector<16xf32> to vector<16x1xf32>
    %93 = vector.broadcast %92 : vector<16x1xf32> to vector<16x16xf32>
    %94 = arith.subf %90, %93 : vector<16x16xf32>
    %95 = math.exp %94 : vector<16x16xf32>
    %cst_36 = arith.constant dense<0.000000e+00> : vector<16xf32>
    %96 = vector.multi_reduction <add>, %95, %cst_36 [1] : vector<16x16xf32> to vector<16xf32>
    %97 = vector.shape_cast %96 : vector<16xf32> to vector<16x1xf32>
    %98 = vector.broadcast %97 : vector<16x1xf32> to vector<16x16xf32>
    %99 = arith.divf %95, %98 : vector<16x16xf32>
    %cst_37 = arith.constant dense<0.000000e+00> : vector<16x8xf32>
    %100 = tpu.matmul %99, %86, %cst_37 {dimension_numbers = #tpu.dot_dimension_numbers<[1], [0], [0], [1], [0, 0, 1, 1], [], []>} : vector<16x16xf32>, vector<16x8xf32>, vector<16x8xf32> -> vector<16x8xf32>
    %101 = vector.extract_strided_slice %22 {offsets = [24, 0], sizes = [8, 32], strides = [1, 1]} : vector<32x32xf32> to vector<8x32xf32>
    %cst_38 = arith.constant dense<0.000000e+00> : vector<16x32xf32>
    %102 = tpu.matmul %100, %101, %cst_38 {dimension_numbers = #tpu.dot_dimension_numbers<[1], [0], [0], [1], [0, 0, 1, 1], [], []>} : vector<16x8xf32>, vector<8x32xf32>, vector<16x32xf32> -> vector<16x32xf32>
    %103 = arith.addf %83, %102 : vector<16x32xf32>
    %104 = vector.broadcast %7 : vector<1x32xf32> to vector<16x32xf32>
    %105 = arith.addf %103, %104 : vector<16x32xf32>
    %106 = arith.addf %0, %105 : vector<16x32xf32>
    %cst_39 = arith.constant dense<0.000000e+00> : vector<16xf32>
    %107 = vector.multi_reduction <add>, %106, %cst_39 [1] : vector<16x32xf32> to vector<16xf32>
    %108 = vector.shape_cast %107 : vector<16xf32> to vector<16x1xf32>
    %cst_40 = arith.constant 3.200000e+01 : f32
    %109 = vector.broadcast %cst_40 : f32 to vector<16x1xf32>
    %110 = arith.divf %108, %109 : vector<16x1xf32>
    %111 = vector.broadcast %110 : vector<16x1xf32> to vector<16x32xf32>
    %112 = arith.subf %106, %111 : vector<16x32xf32>
    %113 = arith.mulf %112, %112 : vector<16x32xf32>
    %cst_41 = arith.constant dense<0.000000e+00> : vector<16xf32>
    %114 = vector.multi_reduction <add>, %113, %cst_41 [1] : vector<16x32xf32> to vector<16xf32>
    %115 = vector.shape_cast %114 : vector<16xf32> to vector<16x1xf32>
    %cst_42 = arith.constant 3.200000e+01 : f32
    %116 = vector.broadcast %cst_42 : f32 to vector<16x1xf32>
    %117 = arith.divf %115, %116 : vector<16x1xf32>
    %118 = vector.broadcast %110 : vector<16x1xf32> to vector<16x32xf32>
    %119 = arith.subf %106, %118 : vector<16x32xf32>
    %cst_43 = arith.constant 9.99999974E-6 : f32
    %120 = vector.broadcast %cst_43 : f32 to vector<16x1xf32>
    %121 = arith.addf %117, %120 : vector<16x1xf32>
    %122 = math.rsqrt %121 : vector<16x1xf32>
    %123 = vector.broadcast %122 : vector<16x1xf32> to vector<16x32xf32>
    %124 = arith.mulf %119, %123 : vector<16x32xf32>
    %125 = vector.broadcast %9 : vector<1x32xf32> to vector<16x32xf32>
    %126 = arith.mulf %124, %125 : vector<16x32xf32>
    %127 = vector.broadcast %10 : vector<1x32xf32> to vector<16x32xf32>
    %128 = arith.addf %126, %127 : vector<16x32xf32>
    %c0_44 = arith.constant 0 : index
    %c0_45 = arith.constant 0 : index
    %129 = vector.load %arg7[%c0_44, %c0_45] : memref<32x64xf32, #tpu.memory_space<vmem>>, vector<32x64xf32>
    %cst_46 = arith.constant dense<0.000000e+00> : vector<16x64xf32>
    %130 = tpu.matmul %128, %129, %cst_46 {dimension_numbers = #tpu.dot_dimension_numbers<[1], [0], [0], [1], [0, 0, 1, 1], [], []>} : vector<16x32xf32>, vector<32x64xf32>, vector<16x64xf32> -> vector<16x64xf32>
    %131 = vector.broadcast %5 : vector<1x64xf32> to vector<16x64xf32>
    %132 = arith.addf %130, %131 : vector<16x64xf32>
    %cst_47 = arith.constant 0.000000e+00 : f32
    %133 = vector.broadcast %cst_47 : f32 to vector<16x64xf32>
    %134 = arith.maximumf %132, %133 : vector<16x64xf32>
    %c0_48 = arith.constant 0 : index
    %c0_49 = arith.constant 0 : index
    %135 = vector.load %arg8[%c0_48, %c0_49] : memref<64x32xf32, #tpu.memory_space<vmem>>, vector<64x32xf32>
    %cst_50 = arith.constant dense<0.000000e+00> : vector<16x32xf32>
    %136 = tpu.matmul %134, %135, %cst_50 {dimension_numbers = #tpu.dot_dimension_numbers<[1], [0], [0], [1], [0, 0, 1, 1], [], []>} : vector<16x64xf32>, vector<64x32xf32>, vector<16x32xf32> -> vector<16x32xf32>
    %137 = vector.broadcast %8 : vector<1x32xf32> to vector<16x32xf32>
    %138 = arith.addf %136, %137 : vector<16x32xf32>
    %139 = arith.addf %128, %138 : vector<16x32xf32>
    %cst_51 = arith.constant dense<0.000000e+00> : vector<16xf32>
    %140 = vector.multi_reduction <add>, %139, %cst_51 [1] : vector<16x32xf32> to vector<16xf32>
    %141 = vector.shape_cast %140 : vector<16xf32> to vector<16x1xf32>
    %cst_52 = arith.constant 3.200000e+01 : f32
    %142 = vector.broadcast %cst_52 : f32 to vector<16x1xf32>
    %143 = arith.divf %141, %142 : vector<16x1xf32>
    %144 = vector.broadcast %143 : vector<16x1xf32> to vector<16x32xf32>
    %145 = arith.subf %139, %144 : vector<16x32xf32>
    %146 = arith.mulf %145, %145 : vector<16x32xf32>
    %cst_53 = arith.constant dense<0.000000e+00> : vector<16xf32>
    %147 = vector.multi_reduction <add>, %146, %cst_53 [1] : vector<16x32xf32> to vector<16xf32>
    %148 = vector.shape_cast %147 : vector<16xf32> to vector<16x1xf32>
    %cst_54 = arith.constant 3.200000e+01 : f32
    %149 = vector.broadcast %cst_54 : f32 to vector<16x1xf32>
    %150 = arith.divf %148, %149 : vector<16x1xf32>
    %151 = vector.broadcast %143 : vector<16x1xf32> to vector<16x32xf32>
    %152 = arith.subf %139, %151 : vector<16x32xf32>
    %cst_55 = arith.constant 9.99999974E-6 : f32
    %153 = vector.broadcast %cst_55 : f32 to vector<16x1xf32>
    %154 = arith.addf %150, %153 : vector<16x1xf32>
    %155 = math.rsqrt %154 : vector<16x1xf32>
    %156 = vector.broadcast %155 : vector<16x1xf32> to vector<16x32xf32>
    %157 = arith.mulf %152, %156 : vector<16x32xf32>
    %158 = vector.broadcast %11 : vector<1x32xf32> to vector<16x32xf32>
    %159 = arith.mulf %157, %158 : vector<16x32xf32>
    %160 = vector.broadcast %12 : vector<1x32xf32> to vector<16x32xf32>
    %161 = arith.addf %159, %160 : vector<16x32xf32>
    %c0_56 = arith.constant 0 : index
    %c0_57 = arith.constant 0 : index
    %162 = vector.load %arg10[%c0_56, %c0_57] : memref<16x32xf32, #tpu.memory_space<vmem>>, vector<16x32xf32>
    tpu.vector_store %arg10[%c0_56, %c0_57], %161 {strides = array<i32>} : memref<16x32xf32, #tpu.memory_space<vmem>>, vector<16x32xf32>,
    return
  }
  func.func @transform_0(%arg0: i32) -> (i32, i32) {
    %c0_i32 = arith.constant 0 : i32
    %c0_i32_0 = arith.constant 0 : i32
    %c0_i32_1 = arith.constant 0 : i32
    return %c0_i32, %c0_i32_0 : i32, i32
  }
  func.func @transform_1(%arg0: i32) -> (i32, i32) {
    %c0_i32 = arith.constant 0 : i32
    %c0_i32_0 = arith.constant 0 : i32
    %c0_i32_1 = arith.constant 0 : i32
    return %c0_i32, %c0_i32_0 : i32, i32
  }
  func.func @transform_2(%arg0: i32) -> (i32, i32) {
    %c0_i32 = arith.constant 0 : i32
    %c0_i32_0 = arith.constant 0 : i32
    %c0_i32_1 = arith.constant 0 : i32
    return %c0_i32, %c0_i32_0 : i32, i32
  }
  func.func @transform_3(%arg0: i32) -> (i32, i32) {
    %c0_i32 = arith.constant 0 : i32
    %c0_i32_0 = arith.constant 0 : i32
    %c0_i32_1 = arith.constant 0 : i32
    return %c0_i32, %c0_i32_0 : i32, i32
  }
  func.func @transform_4(%arg0: i32) -> (i32, i32) {
    %c0_i32 = arith.constant 0 : i32
    %c0_i32_0 = arith.constant 0 : i32
    %c0_i32_1 = arith.constant 0 : i32
    return %c0_i32, %c0_i32_0 : i32, i32
  }
  func.func @transform_5(%arg0: i32) -> (i32, i32) {
    %c0_i32 = arith.constant 0 : i32
    %c0_i32_0 = arith.constant 0 : i32
    %c0_i32_1 = arith.constant 0 : i32
    return %c0_i32, %c0_i32_0 : i32, i32
  }
  func.func @transform_6(%arg0: i32) -> (i32, i32) {
    %c0_i32 = arith.constant 0 : i32
    %c0_i32_0 = arith.constant 0 : i32
    %c0_i32_1 = arith.constant 0 : i32
    return %c0_i32, %c0_i32_0 : i32, i32
  }
  func.func @transform_7(%arg0: i32) -> (i32, i32) {
    %c0_i32 = arith.constant 0 : i32
    %c0_i32_0 = arith.constant 0 : i32
    %c0_i32_1 = arith.constant 0 : i32
    return %c0_i32, %c0_i32_0 : i32, i32
  }
  func.func @transform_8(%arg0: i32) -> (i32, i32) {
    %c0_i32 = arith.constant 0 : i32
    %c0_i32_0 = arith.constant 0 : i32
    %c0_i32_1 = arith.constant 0 : i32
    return %c0_i32, %c0_i32_0 : i32, i32
  }
  func.func @transform_9(%arg0: i32) -> (i32, i32) {
    %c0_i32 = arith.constant 0 : i32
    %c0_i32_0 = arith.constant 0 : i32
    %c0_i32_1 = arith.constant 0 : i32
    return %c0_i32, %c0_i32_0 : i32, i32
  }
}

</mosaic_0001>

<bundles_post_ra>
// kernel: tpu_custom_call.1
= control target key start
LH: loop header
LB: loop body
LE: loop exit
PB: predicated region body
PF: predicated region fallthrough
CT: control target
= control target key end

     0   :  { %14 = vsyncpa [#allocation3], 0  ;;  %s2644_s0 = inlined_call_operand.hbm [shape: f32[16,32], index: 0, kind: input, shape index: {}]   ;;  %s2645_s1 = inlined_call_operand.hbm [shape: f32[16,32], index: 1, kind: input, shape index: {}]   ;;  %s2646_s2 = inlined_call_operand.hbm [shape: f32[16,16], index: 2, kind: input, shape index: {}]   ;;  %s2647_s3 = inlined_call_operand.vmem [shape: f32[32,64], index: 3, kind: input, shape index: {}]   ;;  %s2648_s4 = inlined_call_operand.vmem [shape: f32[32,32], index: 4, kind: input, shape index: {}]   ;;  %s2649_s5 = inlined_call_operand.vmem [shape: f32[32,32], index: 5, kind: input, shape index: {}]   ;;  %s2650_s6 = inlined_call_operand.hbm [shape: f32[32,64], index: 6, kind: input, shape index: {}]   ;;  %s2651_s7 = inlined_call_operand.vmem [shape: f32[64,32], index: 7, kind: input, shape index: {}]   ;;  %s2652_s8 = inlined_call_operand.vmem [shape: f32[8,64], index: 8, kind: input, shape index: {}]   ;;  %s2653_s9 = inlined_call_operand.hbm [shape: f32[16,32], index: 9, kind: output, shape index: {}]  }
   0x1   :  { %15 = vsyncpa [#allocation6], 0 }
   0x2   :  { %16 = vsyncpa [#allocation9], 0 }
   0x3   :  { %17 = vsyncpa [#allocation4], 0  ;;  %s2246_s30 = smov [#allocation5]   ;;  %s2247_s11 = smov [#allocation2]  }
   0x4   :  { %s35_s10 = sshll.u32 %s2246_s30, 4  ;;  %s23_s12 = sshll.u32 %s2247_s11, 4  ;;  %s36_s10 = int_to_ptr.vmem [resolvable:$true] %s35_s10  ;;  %s2310_s12 = int_to_ptr.vmem [resolvable:$true] %s23_s12 }
   0x5   :  { %s2128_s15 = scalar_lea.hbm %s2645_s1, 256 }
   0x6   :  { %p2129_p0 = scmp.ne.s32.totalorder %s2645_s1, %s2128_s15  ;;  %p2132_p1 = scmp.lt.u32.totalorder %s2128_s15, %s2645_s1 }
   0x8   :  { %p2134_p2 = pnand %p2132_p1, %p2129_p0 }
   0xa   :  { %2137 = shalt.err (!%p2134_p2)
}
   0xb   :  { %s2138_s20 = scalar_lea.vmem %s36_s10, 256  ;;  %p2143_p4 = scmp.lt.s32.totalorder %s36_s10, %s36_s10 }
   0xc   :  { %p2139_p3 = scmp.ne.s32.totalorder %s36_s10, %s2138_s20  ;;  %p2144_p5 = scmp.lt.s32.totalorder %s2138_s20, %s2138_s20 }
   0xe   :  { %p2145_p6 = por %p2144_p5, %p2143_p4 }
  0x10   :  { %p2146_p7 = pnand %p2145_p6, %p2139_p3 }
  0x12   :  { %2149 = shalt.err (!%p2146_p7)
}
  0x13   :  { %s2248_s21 = smov 128   ;;  %s2249_s22 = smov 8  }
  0x14   :  { %41 = dma.hbm_to_vmem [thread:$0]  %s2645_s1, 256, %s36_s10, [#allocation6], %s2248_s21, %s2248_s21, %s2249_s22  }
  0x15   :  { %s2150_s27 = scalar_lea.hbm %s2644_s0, 256 }
  0x16   :  { %p2151_p8 = scmp.ne.s32.totalorder %s2644_s0, %s2150_s27  ;;  %p2154_p9 = scmp.lt.u32.totalorder %s2150_s27, %s2644_s0 }
  0x18   :  { %p2156_p10 = pnand %p2154_p9, %p2151_p8 }
  0x1a   :  { %2159 = shalt.err (!%p2156_p10)
}
  0x1b   :  { %s2160_s13 = scalar_lea.vmem %s2310_s12, 256  ;;  %p2165_p12 = scmp.lt.s32.totalorder %s2310_s12, %s2310_s12 }
  0x1c   :  { %p2161_p11 = scmp.ne.s32.totalorder %s2310_s12, %s2160_s13  ;;  %p2166_p13 = scmp.lt.s32.totalorder %s2160_s13, %s2160_s13 }
  0x1e   :  { %p2167_p0 = por %p2166_p13, %p2165_p12 }
  0x20   :  { %p2168_p1 = pnand %p2167_p0, %p2161_p11 }
  0x22   :  { %2171 = shalt.err (!%p2168_p1)
}
  0x23   :  { %29 = dma.hbm_to_vmem [thread:$0]  %s2644_s0, 256, %s2310_s12, [#allocation3], %s2248_s21, %s2248_s21, %s2249_s22  }
  0x24   :  { %s2250_s14 = smov [#allocation7]   ;;  %s2251_s16 = smov [#allocation8]  }
  0x25   :  { %s47_s15 = sshll.u32 %s2250_s14, 4  ;;  %s65_s17 = sshll.u32 %s2251_s16, 4  ;;  %s48_s15 = int_to_ptr.vmem [resolvable:$true] %s47_s15  ;;  %s2347_s17 = int_to_ptr.vmem [resolvable:$true] %s65_s17 }
  0x26   :  { %s2172_s20 = scalar_lea.hbm %s2646_s2, 256 }
  0x27   :  { %p2173_p2 = scmp.ne.s32.totalorder %s2646_s2, %s2172_s20  ;;  %p2176_p3 = scmp.lt.u32.totalorder %s2172_s20, %s2646_s2 }
  0x29   :  { %p2178_p4 = pnand %p2176_p3, %p2173_p2 }
  0x2b   :  { %2181 = shalt.err (!%p2178_p4)
}
  0x2c   :  { %s2182_s0 = scalar_lea.vmem %s48_s15, 256  ;;  %p2187_p6 = scmp.lt.s32.totalorder %s48_s15, %s48_s15 }
  0x2d   :  { %p2183_p5 = scmp.ne.s32.totalorder %s48_s15, %s2182_s0  ;;  %p2188_p7 = scmp.lt.s32.totalorder %s2182_s0, %s2182_s0 }
  0x2f   :  { %p2189_p8 = por %p2188_p7, %p2187_p6 }
  0x31   :  { %p2190_p9 = pnand %p2189_p8, %p2183_p5 }
  0x33   :  { %2193 = shalt.err (!%p2190_p9)
}
  0x34   :  { %53 = dma.hbm_to_vmem [thread:$0]  %s2646_s2, 256, %s48_s15, [#allocation6], %s2248_s21, %s2248_s21, %s2249_s22  }
  0x35   :  { %s2194_s30 = scalar_lea.hbm %s2650_s6, 512 }
  0x36   :  { %p2195_p10 = scmp.ne.s32.totalorder %s2650_s6, %s2194_s30  ;;  %p2198_p11 = scmp.lt.u32.totalorder %s2194_s30, %s2650_s6 }
  0x38   :  { %p2200_p12 = pnand %p2198_p11, %p2195_p10 }
  0x3a   :  { %2203 = shalt.err (!%p2200_p12)
}
  0x3b   :  { %s2204_s14 = scalar_lea.vmem %s2347_s17, 512  ;;  %p2209_p0 = scmp.lt.s32.totalorder %s2347_s17, %s2347_s17 }
  0x3c   :  { %p2205_p13 = scmp.ne.s32.totalorder %s2347_s17, %s2204_s14  ;;  %p2210_p1 = scmp.lt.s32.totalorder %s2204_s14, %s2204_s14 }
  0x3e   :  { %p2211_p2 = por %p2210_p1, %p2209_p0 }
  0x40   :  { %p2212_p3 = pnand %p2211_p2, %p2205_p13 }
  0x42   :  { %2215 = shalt.err (!%p2212_p3)
}
  0x43   :  { %71 = dma.hbm_to_vmem [thread:$0]  %s2650_s6, 512, %s2347_s17, [#allocation9], %s2248_s21, %s2248_s21, %s2249_s22  }
  0x44   :  { %2238 = dma.done.wait [#allocation3], 256  }
  0x45   :  { %2239 = vsyncadd [#allocation3], 4294967040 }
  0x46   :  { %2240 = dma.done.wait [#allocation6], 512  }
  0x47   :  { %2241 = vsyncadd [#allocation6], 4294966784 }
  0x48   :  { %2242 = dma.done.wait [#allocation9], 512  }
  0x49   :  { %2243 = vsyncadd [#allocation9], 4294966784  ;;  %v97_v0 = vld [vmem:[%s2647_s3] sm:$0xff]  ;;  %v98_v1 = vld [vmem:[%s2647_s3 + $0x8] sm:$0xff]  ;;  %vm105_vm0 = vcmask 261120   ;;  %v101_v12 = vlaneseq  ;;  %vm286_vm1 = vcmask 64512  }
  0x4a   :  { %v99_v2 = vld [vmem:[%s2647_s3 + $0x10] sm:$0xff]  ;;  %v1953_v3 = vpack.c.bf16 %v98_v1, %v97_v0  ;;  %v100_v4 = vld [vmem:[%s2647_s3 + $0x18] sm:$0xff]  ;;  %v2396_v5 = vld [vmem:[#allocation2] sm:$0xff]  ;;  %s2252_s29 = smov 96   ;;  %vm374_vm3 = vcmask 130048   ;;  %s2254_s13 = smov 120  }
  0x4b   :  { %v90_v6 = vld [vmem:[#allocation5] sm:$0xff]  ;;  %v1957_v7 = vpack.c.bf16 %v100_v4, %v99_v2  ;;  %v2400_v9 = vld [vmem:[#allocation2 + $0x8] sm:$0xff]  ;;  %v91_v10 = vld [vmem:[#allocation5 + $0x8] sm:$0xff]  ;;  %v2406_v13 = vshrl.u32 %v101_v12, 7  ;;  %s2255_s1 = smov 80   ;;  %s2256_s10 = smov 112  }
  0x4c   :  { %v95_v8 = vadd.f32 %v90_v6, %v2396_v5  ;;  %1954 = vmatprep.subr.bf16.mxu1 %v1953_v3  ;;  %v96_v11 = vadd.f32 %v91_v10, %v2400_v9  ;;  %v2412_v15 = vld [vmem:[%s2652_s8] sm:$0xff]  ;;  %v188_v23 = vld [vmem:[%s2648_s4 + $0x8] sm:$0xff]  ;;  %v189_v24 = vld [vmem:[%s2648_s4 + $0x10] sm:$0xff]  ;;  %s2257_s14 = smov 104   ;;  %s2258_s2 = smov 72   ;;  %vm1570_vm4 = vcmask 523264  }
  0x4d   :  { %1956 = vmatpush3.bf16.msra.mxu1 %v1953_v3  ;;  %v103_v14 = vsub.s32 0, %v2406_v13  ;;  %v187_v22 = vld [vmem:[%s2648_s4] sm:$0xff]  ;;  %v190_v26 = vld [vmem:[%s2648_s4 + $0x18] sm:$0xff]  ;;  %vm2443_vm2 = vmpackc.low %vm286_vm1, %vm286_vm1  ;;  %v193_v43 = vsub.s32 2, %v2406_v13  ;;  %s2253_s4 = smov 88  }
  0x4e   :  { %1833 = vmatprep.mubr.msk.f32.mxu1 %vm105_vm0, %v95_v8  ;;  %1958 = vmatprep.subr.bf16.mxu1 %v1957_v7  ;;  %v1961_v25 = vpack.c.bf16 %v188_v23, %v187_v22  ;;  %v1965_v27 = vpack.c.bf16 %v190_v26, %v189_v24  ;;  %v2453_v34 = vld [vmem:[#allocation7 + $0x8] sm:$0xff]  ;;  %v2455_v37 = vld [vmem:[#allocation7] sm:$0xff] }
  0x4f   :  { %v104_v16 = vrot.slane %v2412_v15, %v103_v14  ;;  %v2463_v44 = vrot.slane %v2412_v15, %v193_v43  ;;  %v277_v31 = vld [vmem:[%s2649_s5 + $0x8] sm:$0xff] }
  0x51   :  { %1960 = vmatpush3.bf16.msra.mxu1 %v1957_v7 }
  0x52   :  { %1962 = vmatprep.subr.bf16.mxu1 %v1961_v25 }
  0x54   :  { %1834 = vmatmul.mubr.msk.f32.vlgmr.msra.gmra.mrb[0].mxu1 %vm105_vm0, %v96_v11 }
  0x55   :  { %1844 = vmatprep.mubr.msk.f32.mxu1 %vm105_vm0, %v2396_v5  ;;  %1964 = vmatpush3.bf16.msra.mxu1 %v1961_v25 }
  0x56   :  { %1966 = vmatprep.subr.bf16.mxu1 %v1965_v27 }
  0x59   :  { %1968 = vmatpush3.bf16.msra.mxu1 %v1965_v27 }
  0x5c   :  { %1845 = vmatmul.mubr.msk.f32.vlgmr.msra.gmra.mrb[2].mxu1 %vm105_vm0, %v2400_v9 }
 0x127   :  { %v1835_v17 = vpop.f32.mrb[0].mxu1 }
 0x128   :  { %v2415_v18 = vadd.f32 %v1835_v17, %v104_v16  ;;  %v178_v19 = vpop.f32.mrb[1].mxu1 }
 0x129   :  { %v2417_v20 = vadd.f32 %v178_v19, %v104_v16 }
 0x12b   :  { %1851 = vmatprep.mubr.msk.f32.mxu0 %vm286_vm1, %v2417_v20  ;;  %v2423_v21 = vpack.i.bf16 %v2415_v18, %v2417_v20 }
 0x12d   :  { %2054 = vrot.lane.b32.xlu0 %v2423_v21, %s2252_s29 }
 0x12f   :  { %v1846_v45 = vpop.f32.mrb[2].mxu1 }
 0x130   :  { %v267_v46 = vpop.f32.mrb[3].mxu1  ;;  %v2466_v47 = vadd.f32 %v1846_v45, %v2463_v44 }
 0x131   :  { %v2469_v48 = vadd.f32 %v267_v46, %v2463_v44 }
 0x133   :  { %v1975_v49 = vpack.c.bf16 %v2466_v47, %v2469_v48 }
 0x135   :  { %1976 = vmatprep.subr.bf16.mxu1 %v1975_v49 }
 0x136   :  { %1978 = vmatpush3.bf16.msra.mxu1 %v1975_v49 }
 0x19f   :  { %v2055_v28 = vpop.permute.xlu0 %2054 }
 0x1a0   :  { %v2057_v29 = vunpack.i.h.bf16 %v2055_v28  ;;  %v2056_v30 = vunpack.i.l.bf16 %v2055_v28 }
 0x1a2   :  { %v1969_v32 = vpack.c.bf16 %v2057_v29, %v2056_v30 }
 0x1a4   :  { %1971 = vmatprep.subr.msk.bf16.mxu0 %vm2443_vm2, %v1969_v32 }
 0x1a5   :  { %1974 = vmatpush3.bf16.xpose.msk.msra.mxu0 %vm2443_vm2, %v1969_v32 }
 0x1ac   :  { %1852 = vmatmul.mubr.msk.f32.vlgmr.msra.gmra.mrb[0].mxu0 %vm286_vm1, %v2415_v18 }
 0x27f   :  { %v1853_v33 = vpop.f32.mrb[0].mxu0 }
 0x280   :  { %v371_v35 = vmul.f32 0.35355338, %v1853_v33  ;;  %v361_v36 = vpop.f32.mrb[1].mxu0 }
 0x281   :  { %v370_v38 = vmul.f32 0.35355338, %v361_v36 }
 0x282   :  { %v373_v39 = vadd.f32 %v371_v35, %v2453_v34  ;;  %v2509_v35 = vpack.i.bf16 %v2466_v47, %v2469_v48 }
 0x283   :  { %v372_v40 = vadd.f32 %v370_v38, %v2455_v37 }
 0x284   :  { %v378_v41 = vsel %vm374_vm3, %v373_v39, -inf }
 0x285   :  { %379 = vmax.xlane.f32.xlu1 %v378_v41  ;;  %v375_v42 = vsel %vm374_vm3, %v372_v40, -inf }
 0x286   :  { %376 = vmax.xlane.f32.xlu0 %v375_v42 }
 0x296   :  { %2059 = vrot.lane.b32.xlu1 %v2423_v21, %s2253_s4 }
 0x29a   :  { %478 = vrot.lane.b32.xlu1 %v2417_v20, %s2254_s13 }
 0x29c   :  { %2064 = vrot.lane.b32.xlu0 %v2423_v21, %s2255_s1 }
 0x312   :  { %v380_v50 = vpop.xlane.xlu1 %379 }
 0x313   :  { %v382_v51 = vsub.f32 %v373_v39, %v380_v50  ;;  %v377_v52 = vpop.xlane.xlu0 %376 }
 0x314   :  { %v381_v53 = vsub.f32 %v372_v40, %v377_v52 }
 0x315   :  { %v385_v54 = vmul.f32 1.442695, %v382_v51 }
 0x316   :  { %v383_v55 = vmul.f32 1.442695, %v381_v53  ;;  %v2060_v56 = vpop.permute.xlu1 %2059 }
 0x317   :  { %2088 = vpow2.f32 %v385_v54  ;;  %v2062_v57 = vunpack.i.h.bf16 %v2060_v56  ;;  %v2061_v58 = vunpack.i.l.bf16 %v2060_v56  ;;  %v2065_v3 = vpop.permute.xlu0 %2064 }
 0x318   :  { %2090 = vpow2.f32 %v383_v55  ;;  %v2067_v7 = vunpack.i.h.bf16 %v2065_v3  ;;  %v2066_v8 = vunpack.i.l.bf16 %v2065_v3 }
 0x319   :  { %v1979_v59 = vpack.c.bf16 %v2062_v57, %v2061_v58 }
 0x31a   :  { %v479_v0 = vpop.permute.xlu1 %478  ;;  %v1989_v12 = vpack.c.bf16 %v2067_v7, %v2066_v8 }
 0x31b   :  { %1981 = vmatprep.subr.msk.bf16.mxu1 %vm2443_vm2, %v1979_v59 }
 0x321   :  { %v2089_v60 = vpop.eup %2088 }
 0x322   :  { %v390_v61 = vsel %vm374_vm3, %v2089_v60, 0.0  ;;  %v2091_v62 = vpop.eup %2090 }
 0x323   :  { %391 = vadd.xlane.f32.xlu1 %v390_v61  ;;  %v387_v63 = vsel %vm374_vm3, %v2091_v62, 0.0 }
 0x327   :  { %388 = vadd.xlane.f32.xlu1 %v387_v63 }
 0x338   :  { %480 = vrot.lane.b32.xlu1 %v2415_v18, %s2254_s13 }
 0x33c   :  { %846 = vrot.lane.b32.xlu1 %v2417_v20, %s2256_s10 }
 0x340   :  { %848 = vrot.lane.b32.xlu1 %v2415_v18, %s2256_s10 }
 0x3b0   :  { %v392_v1 = vpop.xlane.xlu1 %391 }
 0x3b1   :  { %2092 = vrcp.f32 %v392_v1 }
 0x3b4   :  { %v389_v2 = vpop.xlane.xlu1 %388 }
 0x3b5   :  { %2094 = vrcp.f32 %v389_v2 }
 0x3b8   :  { %v481_v14 = vpop.permute.xlu1 %480 }
 0x3bb   :  { %v2093_v4 = vpop.eup %2092 }
 0x3bc   :  { %v396_v11 = vmul.f32 %v2093_v4, %v2089_v60  ;;  %v847_v16 = vpop.permute.xlu1 %846 }
 0x3bf   :  { %v2095_v6 = vpop.eup %2094 }
 0x3c0   :  { %v394_v10 = vmul.f32 %v2095_v6, %v2091_v62  ;;  %v849_v17 = vpop.permute.xlu1 %848 }
 0x3c2   :  { %1858 = vmatprep.mubr.msk.f32.mxu1 %vm374_vm3, %v394_v10 }
 0x3c3   :  { %1859 = vmatmul.mubr.msk.f32.vlgmr.msra.gmra.mrb[4].mxu1 %vm374_vm3, %v396_v11 }
 0x3c4   :  { %1984 = vmatpush3.bf16.xpose.msk.msra.mxu1 %vm2443_vm2, %v1979_v59  ;;  %1865 = vmatprep.mubr.msk.f32.mxu1 %vm286_vm1, %v479_v0 }
 0x3c5   :  { %1991 = vmatprep.subr.msk.bf16.mxu1 %vm2443_vm2, %v1989_v12 }
 0x3cb   :  { %1866 = vmatmul.mubr.msk.f32.vlgmr.msra.gmra.mrb[6].mxu1 %vm286_vm1, %v481_v14 }
 0x3cc   :  { %1994 = vmatpush3.bf16.xpose.msk.msra.mxu1 %vm2443_vm2, %v1989_v12  ;;  %1889 = vmatprep.mubr.msk.f32.mxu1 %vm286_vm1, %v847_v16 }
 0x3d3   :  { %1890 = vmatmul.mubr.msk.f32.vlgmr.msra.gmra.mrb[8].mxu1 %vm286_vm1, %v849_v17  ;;  %v276_v17 = vld [vmem:[%s2649_s5] sm:$0xff] }
 0x496   :  { %v2499_v19 = vpop.f32.mrb[4].mxu1 }
 0x497   :  { %v2501_v22 = vpop.f32.mrb[5].mxu1 }
 0x49e   :  { %v1867_v23 = vpop.f32.mrb[6].mxu1 }
 0x49f   :  { %v570_v24 = vmul.f32 0.35355338, %v1867_v23  ;;  %v560_v25 = vpop.f32.mrb[7].mxu1 }
 0x4a0   :  { %v569_v26 = vmul.f32 0.35355338, %v560_v25 }
 0x4a1   :  { %v572_v27 = vadd.f32 %v570_v24, %v2453_v34 }
 0x4a2   :  { %v571_v28 = vadd.f32 %v569_v26, %v2455_v37 }
 0x4a3   :  { %v576_v29 = vsel %vm374_vm3, %v572_v27, -inf }
 0x4a4   :  { %577 = vmax.xlane.f32.xlu0 %v576_v29  ;;  %v573_v30 = vsel %vm374_vm3, %v571_v28, -inf }
 0x4a5   :  { %574 = vmax.xlane.f32.xlu1 %v573_v30 }
 0x4a6   :  { %v1891_v32 = vpop.f32.mrb[8].mxu1 }
 0x4a7   :  { %v928_v33 = vpop.f32.mrb[9].mxu1  ;;  %v938_v36 = vmul.f32 0.35355338, %v1891_v32 }
 0x4a8   :  { %v937_v58 = vmul.f32 0.35355338, %v928_v33 }
 0x4a9   :  { %v940_v38 = vadd.f32 %v938_v36, %v2453_v34 }
 0x4aa   :  { %v939_v59 = vadd.f32 %v937_v58, %v2455_v37 }
 0x4ab   :  { %v944_v39 = vsel %vm374_vm3, %v940_v38, -inf }
 0x4ac   :  { %v941_v60 = vsel %vm374_vm3, %v939_v59, -inf }
 0x4ba   :  { %2069 = vrot.lane.b32.xlu0 %v2509_v35, %s2254_s13 }
 0x4be   :  { %1135 = vrot.lane.b32.xlu0 %v2415_v18, %s2257_s14 }
 0x4dd   :  { %945 = vmax.xlane.f32.xlu0 %v944_v39 }
 0x531   :  { %v578_v40 = vpop.xlane.xlu0 %577 }
 0x532   :  { %v580_v41 = vsub.f32 %v572_v27, %v578_v40  ;;  %v575_v42 = vpop.xlane.xlu1 %574 }
 0x533   :  { %v579_v43 = vsub.f32 %v571_v28, %v575_v42 }
 0x534   :  { %v583_v45 = vmul.f32 1.442695, %v580_v41 }
 0x535   :  { %v581_v46 = vmul.f32 1.442695, %v579_v43  ;;  %v2070_v47 = vpop.permute.xlu0 %2069 }
 0x536   :  { %v2072_v48 = vunpack.i.h.bf16 %v2070_v47  ;;  %v2071_v49 = vunpack.i.l.bf16 %v2070_v47 }
 0x537   :  { %2096 = vpow2.f32 %v581_v46 }
 0x538   :  { %v1985_v50 = vpack.c.bf16 %v2072_v48, %v2071_v49  ;;  %2098 = vpow2.f32 %v583_v45 }
 0x539   :  { %v1136_v54 = vpop.permute.xlu0 %1135 }
 0x53a   :  { %1986 = vmatprep.subr.bf16.mxu0 %v1985_v50 }
 0x53b   :  { %1988 = vmatpush3.bf16.msra.mxu0 %v1985_v50 }
 0x53c   :  { %1875 = vmatprep.subr.mxu0 %v277_v31 }
 0x541   :  { %v2097_v18 = vpop.eup %2096 }
 0x542   :  { %v585_v51 = vsel %vm374_vm3, %v2097_v18, 0.0  ;;  %v2099_v52 = vpop.eup %2098 }
 0x543   :  { %586 = vadd.xlane.f32.xlu1 %v585_v51  ;;  %v588_v53 = vsel %vm374_vm3, %v2099_v52, 0.0 }
 0x547   :  { %589 = vadd.xlane.f32.xlu1 %v588_v53 }
 0x558   :  { %2074 = vrot.lane.b32.xlu1 %v2423_v21, %s2258_s2 }
 0x55c   :  { %1133 = vrot.lane.b32.xlu1 %v2417_v20, %s2257_s14 }
 0x56a   :  { %v946_v55 = vpop.xlane.xlu0 %945 }
 0x56b   :  { %v948_v56 = vsub.f32 %v940_v38, %v946_v55 }
 0x56d   :  { %v951_v57 = vmul.f32 1.442695, %v948_v56 }
 0x56f   :  { %2100 = vpow2.f32 %v951_v57 }
 0x579   :  { %v2524_v61 = vpop.eup %2100 }
 0x57a   :  { %v956_v62 = vsel %vm374_vm3, %v2524_v61, 0.0 }
 0x580   :  { %942 = vmax.xlane.f32.xlu1 %v941_v60 }
 0x584   :  { %957 = vadd.xlane.f32.xlu1 %v956_v62 }
 0x5d0   :  { %v587_v21 = vpop.xlane.xlu1 %586 }
 0x5d1   :  { %2102 = vrcp.f32 %v587_v21 }
 0x5d4   :  { %v590_v20 = vpop.xlane.xlu1 %589 }
 0x5d5   :  { %2104 = vrcp.f32 %v590_v20 }
 0x5d8   :  { %v2075_v63 = vpop.permute.xlu1 %2074 }
 0x5d9   :  { %v2077_v0 = vunpack.i.h.bf16 %v2075_v63  ;;  %v2076_v1 = vunpack.i.l.bf16 %v2075_v63 }
 0x5db   :  { %v2103_v2 = vpop.eup %2102  ;;  %v1999_v3 = vpack.c.bf16 %v2077_v0, %v2076_v1 }
 0x5dc   :  { %v1134_v4 = vpop.permute.xlu1 %1133  ;;  %v592_v6 = vmul.f32 %v2103_v2, %v2097_v18 }
 0x5dd   :  { %2001 = vmatprep.subr.msk.bf16.mxu1 %vm2443_vm2, %v1999_v3  ;;  %1908 = vmatprep.mubr.msk.f32.mxu1 %vm286_vm1, %v1134_v4 }
 0x5de   :  { %1872 = vmatprep.mubr.msk.f32.mxu0 %vm374_vm3, %v592_v6  ;;  %2004 = vmatpush3.bf16.xpose.msk.msra.mxu1 %vm2443_vm2, %v1999_v3 }
 0x5df   :  { %v2105_v7 = vpop.eup %2104 }
 0x5e0   :  { %v594_v8 = vmul.f32 %v2105_v7, %v2099_v52 }
 0x5e2   :  { %1873 = vmatmul.mubr.msk.f32.vlgmr.msra.gmra.mrb[2].mxu0 %vm374_vm3, %v594_v8 }
 0x5e3   :  { %1876 = vmatpush3.msra.mxu0 %v277_v31 }
 0x5e4   :  { %1880 = vmatprep.subr.mxu0 %v276_v17 }
 0x5e5   :  { %1909 = vmatmul.mubr.msk.f32.vlgmr.msra.gmra.mrb[10].mxu1 %vm286_vm1, %v1136_v54 }
 0x60d   :  { %v943_v10 = vpop.xlane.xlu1 %942 }
 0x60e   :  { %v947_v11 = vsub.f32 %v939_v59, %v943_v10 }
 0x610   :  { %v949_v12 = vmul.f32 1.442695, %v947_v11 }
 0x611   :  { %v958_v25 = vpop.xlane.xlu1 %957 }
 0x612   :  { %2106 = vpow2.f32 %v949_v12 }
 0x61c   :  { %v2107_v14 = vpop.eup %2106 }
 0x61d   :  { %v953_v16 = vsel %vm374_vm3, %v2107_v14, 0.0 }
 0x61e   :  { %954 = vadd.xlane.f32.xlu0 %v953_v16 }
 0x634   :  { %2079 = vrot.lane.b32.xlu0 %v2509_v35, %s2256_s10 }
 0x638   :  { %1421 = vrot.lane.b32.xlu0 %v2463_v44, %s2252_s29 }
 0x6ab   :  { %v955_v23 = vpop.xlane.xlu0 %954 }
 0x6ac   :  { %2108 = vrcp.f32 %v955_v23 }
 0x6ad   :  { %2110 = vrcp.f32 %v958_v25 }
 0x6af   :  { %v2080_v24 = vpop.permute.xlu0 %2079 }
 0x6b0   :  { %v2082_v26 = vunpack.i.h.bf16 %v2080_v24  ;;  %v2081_v27 = vunpack.i.l.bf16 %v2080_v24 }
 0x6b2   :  { %v1995_v30 = vpack.c.bf16 %v2082_v26, %v2081_v27 }
 0x6b3   :  { %v1422_v1 = vpop.permute.xlu0 %1421 }
 0x6b5   :  { %v1874_v28 = vpop.f32.mrb[2].mxu0 }
 0x6b6   :  { %v675_v29 = vpop.f32.mrb[3].mxu0  ;;  %v2109_v38 = vpop.eup %2108 }
 0x6b7   :  { %1877 = vmatprep.mubr.msk.f32.mxu0 %vm286_vm1, %v675_v29  ;;  %v2111_v42 = vpop.eup %2110  ;;  %v960_v43 = vmul.f32 %v2109_v38, %v2107_v14  ;;  %v1472_v29 = vld [vmem:[#allocation8 + $0x8] sm:$0xff]  ;;  %v1563_v38 = vld [vmem:[%s2651_s7 + $0x8] sm:$0xff] }
 0x6b8   :  { %1878 = vmatmul.mubr.msk.f32.vlgmr.msra.gmra.mrb[4].mxu0 %vm286_vm1, %v1874_v28  ;;  %v1910_v32 = vpop.f32.mrb[10].mxu1  ;;  %v1471_v28 = vld [vmem:[#allocation8] sm:$0xff] }
 0x6b9   :  { %1881 = vmatpush3.msra.mxu0 %v276_v17  ;;  %1882 = vmatprep.mubr.msk.f32.mxu0 %vm286_vm1, %v2501_v22  ;;  %v1215_v44 = vpop.f32.mrb[11].mxu1  ;;  %v1225_v33 = vmul.f32 0.35355338, %v1910_v32  ;;  %v962_v22 = vmul.f32 %v2111_v42, %v2524_v61  ;;  %v279_v61 = vld [vmem:[%s2649_s5 + $0x18] sm:$0xff]  ;;  %v1473_v32 = vld [vmem:[#allocation8 + $0x10] sm:$0xff] }
 0x6ba   :  { %1996 = vmatprep.subr.bf16.mxu0 %v1995_v30  ;;  %v1224_v36 = vmul.f32 0.35355338, %v1215_v44  ;;  %v1474_v44 = vld [vmem:[#allocation8 + $0x18] sm:$0xff] }
 0x6bb   :  { %v1227_v41 = vadd.f32 %v1225_v33, %v2453_v34  ;;  %v278_v34 = vld [vmem:[%s2649_s5 + $0x10] sm:$0xff]  ;;  %v2013_v33 = vpack.c.bf16 %v1474_v44, %v1473_v32 }
 0x6bc   :  { %v1226_v39 = vadd.f32 %v1224_v36, %v2455_v37  ;;  %v1562_v36 = vld [vmem:[%s2651_s7] sm:$0xff] }
 0x6bd   :  { %v1231_v45 = vsel %vm374_vm3, %v1227_v41, -inf }
 0x6be   :  { %v1228_v40 = vsel %vm374_vm3, %v1226_v39, -inf }
 0x6bf   :  { %1229 = vmax.xlane.f32.xlu1 %v1228_v40  ;;  %v2017_v40 = vpack.c.bf16 %v1563_v38, %v1562_v36 }
 0x6c0   :  { %1883 = vmatmul.mubr.msk.f32.vlgmr.msra.gmra.mrb[4].mxu0 %vm286_vm1, %v2499_v19 }
 0x6c1   :  { %1998 = vmatpush3.bf16.msra.mxu0 %v1995_v30  ;;  %1896 = vmatprep.mubr.msk.f32.mxu0 %vm374_vm3, %v960_v43  ;;  %v2009_v30 = vpack.c.bf16 %v1472_v29, %v1471_v28  ;;  %v1566_v43 = vld [vmem:[%s2651_s7 + $0x20] sm:$0xff] }
 0x6c2   :  { %1899 = vmatprep.subr.mxu0 %v278_v34 }
 0x6c3   :  { %1232 = vmax.xlane.f32.xlu1 %v1231_v45  ;;  %2010 = vmatprep.subr.bf16.mxu1 %v2009_v30 }
 0x6c4   :  { %1897 = vmatmul.mubr.msk.f32.vlgmr.msra.gmra.mrb[6].mxu0 %vm374_vm3, %v962_v22  ;;  %2012 = vmatpush3.bf16.msra.mxu1 %v2009_v30  ;;  %v1567_v22 = vld [vmem:[%s2651_s7 + $0x28] sm:$0xff] }
 0x6c5   :  { %1900 = vmatpush3.msra.mxu0 %v278_v34  ;;  %2014 = vmatprep.subr.bf16.mxu1 %v2013_v33  ;;  %v2025_v45 = vpack.c.bf16 %v1567_v22, %v1566_v43 }
 0x6c8   :  { %2016 = vmatpush3.bf16.msra.mxu1 %v2013_v33  ;;  %v1688_v33 = vsub.s32 5, %v2406_v13 }
 0x74c   :  { %v1230_v37 = vpop.xlane.xlu1 %1229 }
 0x74d   :  { %v1234_v46 = vsub.f32 %v1226_v39, %v1230_v37  ;;  %v1564_v39 = vld [vmem:[%s2651_s7 + $0x10] sm:$0xff] }
 0x74f   :  { %v1236_v48 = vmul.f32 1.442695, %v1234_v46 }
 0x750   :  { %v1233_v47 = vpop.xlane.xlu1 %1232 }
 0x751   :  { %v1235_v19 = vsub.f32 %v1227_v41, %v1233_v47  ;;  %v1565_v41 = vld [vmem:[%s2651_s7 + $0x18] sm:$0xff] }
 0x752   :  { %v2021_v42 = vpack.c.bf16 %v1565_v41, %v1564_v39 }
 0x753   :  { %v1238_v49 = vmul.f32 1.442695, %v1235_v19 }
 0x755   :  { %2112 = vpow2.f32 %v1238_v49 }
 0x756   :  { %2114 = vpow2.f32 %v1236_v48 }
 0x75f   :  { %v2113_v50 = vpop.eup %2112 }
 0x760   :  { %v1243_v18 = vsel %vm374_vm3, %v2113_v50, 0.0  ;;  %v2115_v51 = vpop.eup %2114 }
 0x761   :  { %1244 = vadd.xlane.f32.xlu1 %v1243_v18  ;;  %v1240_v52 = vsel %vm374_vm3, %v2115_v51, 0.0  ;;  %v1467_v18 = vsub.s32 4, %v2406_v13 }
 0x765   :  { %1241 = vadd.xlane.f32.xlu1 %v1240_v52 }
 0x776   :  { %2084 = vrot.lane.b32.xlu1 %v2509_v35, %s2257_s14 }
 0x797   :  { %v1898_v53 = vpop.f32.mrb[6].mxu0 }
 0x798   :  { %v1041_v54 = vpop.f32.mrb[7].mxu0 }
 0x799   :  { %1901 = vmatprep.mubr.msk.f32.mxu0 %vm286_vm1, %v1041_v54  ;;  %v1468_v54 = vrot.slane %v2412_v15, %v1467_v18 }
 0x79a   :  { %1902 = vmatmul.mubr.msk.f32.vlgmr.msra.gmra.mrb[4].mxu0 %vm286_vm1, %v1898_v53 }
 0x7ee   :  { %v1245_v55 = vpop.xlane.xlu1 %1244 }
 0x7ef   :  { %2116 = vrcp.f32 %v1245_v55 }
 0x7f2   :  { %v1242_v56 = vpop.xlane.xlu1 %1241 }
 0x7f3   :  { %2118 = vrcp.f32 %v1242_v56 }
 0x7f6   :  { %v2085_v57 = vpop.permute.xlu1 %2084 }
 0x7f7   :  { %v2087_v58 = vunpack.i.h.bf16 %v2085_v57  ;;  %v2086_v59 = vunpack.i.l.bf16 %v2085_v57 }
 0x7f9   :  { %v2005_v60 = vpack.c.bf16 %v2087_v58, %v2086_v59  ;;  %v2117_v35 = vpop.eup %2116  ;;  %v1568_v59 = vld [vmem:[%s2651_s7 + $0x30] sm:$0xff] }
 0x7fa   :  { %v1249_v20 = vmul.f32 %v2117_v35, %v2113_v50  ;;  %v1477_v35 = vsub.s32 1, %v2406_v13 }
 0x7fb   :  { %2006 = vmatprep.subr.bf16.mxu0 %v2005_v60 }
 0x7fc   :  { %2008 = vmatpush3.bf16.msra.mxu0 %v2005_v60  ;;  %v1569_v60 = vld [vmem:[%s2651_s7 + $0x38] sm:$0xff]  ;;  %s2259_s7 = smov [#allocation10]  }
 0x7fd   :  { %v2119_v62 = vpop.eup %2118  ;;  %1918 = vmatprep.subr.mxu0 %v279_v61 }
 0x7fe   :  { %v1247_v21 = vmul.f32 %v2119_v62, %v2115_v51  ;;  %v1478_v62 = vrot.slane %v2412_v15, %v1477_v35 }
 0x800   :  { %1915 = vmatprep.mubr.msk.f32.mxu0 %vm374_vm3, %v1247_v21 }
 0x801   :  { %1916 = vmatmul.mubr.msk.f32.vlgmr.msra.gmra.mrb[8].mxu0 %vm374_vm3, %v1249_v20 }
 0x802   :  { %1919 = vmatpush3.msra.mxu0 %v279_v61  ;;  %v2029_v61 = vpack.c.bf16 %v1569_v60, %v1568_v59 }
 0x803   :  { %2018 = vmatprep.subr.bf16.mxu0 %v2017_v40 }
 0x8d4   :  { %v1917_v63 = vpop.f32.mrb[8].mxu0 }
 0x8d5   :  { %v1328_v0 = vpop.f32.mrb[9].mxu0 }
 0x8d6   :  { %1920 = vmatprep.mubr.msk.f32.mxu0 %vm286_vm1, %v1328_v0 }
 0x8d7   :  { %1921 = vmatmul.mubr.msk.f32.vlgmr.msra.gmra.mrb[4].mxu0 %vm286_vm1, %v1917_v63 }
 0x8d8   :  { %2020 = vmatpush3.bf16.msra.mxu0 %v2017_v40  ;;  %v1689_v40 = vrot.slane %v2412_v15, %v1688_v33 }
 0x8d9   :  { %2022 = vmatprep.subr.bf16.mxu0 %v2021_v42 }
 0x8dc   :  { %2024 = vmatpush3.bf16.msra.mxu0 %v2021_v42 }
 0x8dd   :  { %2026 = vmatprep.subr.bf16.mxu0 %v2025_v45 }
 0x8e0   :  { %2028 = vmatpush3.bf16.msra.mxu0 %v2025_v45 }
 0x8e1   :  { %2030 = vmatprep.subr.bf16.mxu0 %v2029_v61 }
 0x8e4   :  { %2032 = vmatpush3.bf16.msra.mxu0 %v2029_v61 }
 0x9aa   :  { %v1922_v2 = vpop.f32.mrb[4].mxu0 }
 0x9ab   :  { %v1425_v3 = vadd.f32 %v1922_v2, %v1422_v1  ;;  %v1409_v4 = vpop.f32.mrb[5].mxu0 }
 0x9ac   :  { %v1424_v6 = vadd.f32 %v1422_v1, %v1409_v4 }
 0x9ad   :  { %v1427_v7 = vadd.f32 %v1425_v3, %v2400_v9 }
 0x9ae   :  { %v1426_v8 = vadd.f32 %v1424_v6, %v2396_v5  ;;  %v1457_v5 = vsub.s32 3, %v2406_v13 }
 0x9af   :  { %v1431_v10 = vsel %vm105_vm0, %v1427_v7, 0.0 }
 0x9b0   :  { %1432 = vadd.xlane.f32.xlu1 %v1431_v10  ;;  %v1428_v11 = vsel %vm105_vm0, %v1426_v8, 0.0  ;;  %v2584_v27 = vrot.slane %v2412_v15, %v1457_v5 }
 0x9b1   :  { %1429 = vadd.xlane.f32.xlu0 %v1428_v11 }
 0xa3d   :  { %v1433_v12 = vpop.xlane.xlu1 %1432 }
 0xa3e   :  { %v1436_v14 = vmul.f32 0.03125, %v1433_v12  ;;  %v1430_v16 = vpop.xlane.xlu0 %1429 }
 0xa3f   :  { %v1435_v31 = vmul.f32 0.03125, %v1430_v16 }
 0xa40   :  { %v1438_v17 = vsub.f32 %v1427_v7, %v1436_v14 }
 0xa41   :  { %v1437_v23 = vsub.f32 %v1426_v8, %v1435_v31 }
 0xa42   :  { %v1440_v24 = vmul.f32 %v1438_v17, %v1438_v17 }
 0xa43   :  { %v1439_v26 = vmul.f32 %v1437_v23, %v1437_v23 }
 0xa44   :  { %v1444_v25 = vsel %vm105_vm0, %v1440_v24, 0.0 }
 0xa45   :  { %1445 = vadd.xlane.f32.xlu0 %v1444_v25  ;;  %v1441_v9 = vsel %vm105_vm0, %v1439_v26, 0.0 }
 0xa49   :  { %1442 = vadd.xlane.f32.xlu0 %v1441_v9 }
 0xa5f   :  { %1460 = vrot.lane.b32.xlu0 %v2584_v27, %s2252_s29 }
 0xad2   :  { %v1446_v34 = vpop.xlane.xlu0 %1445 }
 0xad3   :  { %v1448_v37 = vmul.f32 0.03125, %v1446_v34 }
 0xad5   :  { %v1450_v46 = vadd.f32 1e-05, %v1448_v37 }
 0xad6   :  { %v1443_v47 = vpop.xlane.xlu0 %1442 }
 0xad7   :  { %2120 = vrsqrt.f32 %v1450_v46  ;;  %v1447_v19 = vmul.f32 0.03125, %v1443_v47 }
 0xad9   :  { %v1449_v48 = vadd.f32 1e-05, %v1447_v19 }
 0xada   :  { %v1461_v51 = vpop.permute.xlu0 %1460 }
 0xadb   :  { %2122 = vrsqrt.f32 %v1449_v48 }
 0xae1   :  { %v2121_v49 = vpop.eup %2120 }
 0xae2   :  { %v1454_v50 = vmul.f32 %v2121_v49, %v1438_v17 }
 0xae4   :  { %v1464_v55 = vmul.f32 %v1461_v51, %v1454_v50 }
 0xae5   :  { %v2123_v52 = vpop.eup %2122 }
 0xae6   :  { %v1453_v53 = vmul.f32 %v2123_v52, %v1437_v23  ;;  %v1470_v58 = vadd.f32 %v1468_v54, %v1464_v55 }
 0xae8   :  { %v1463_v56 = vmul.f32 %v1461_v51, %v1453_v53 }
 0xaea   :  { %v1469_v57 = vadd.f32 %v1468_v54, %v1463_v56 }
 0xaec   :  { %1931 = vmatprep.mubr.msk.f32.mxu1 %vm105_vm0, %v1469_v57 }
 0xaed   :  { %1932 = vmatmul.mubr.msk.f32.vlgmr.msra.gmra.mrb[12].mxu1 %vm105_vm0, %v1470_v58 }
 0xbc0   :  { %v1933_v21 = vpop.f32.mrb[12].mxu1 }
 0xbc1   :  { %v1557_v20 = vadd.f32 %v1933_v21, %v1478_v62  ;;  %v1551_v63 = vpop.f32.mrb[13].mxu1 }
 0xbc2   :  { %v1552_v0 = vadd.f32 %v1551_v63, %v1478_v62 }
 0xbc3   :  { %v1561_v2 = vmax.f32 %v1557_v20, 0.0 }
 0xbc4   :  { %v1560_v1 = vmax.f32 %v1552_v0, 0.0 }
 0xbc6   :  { %1950 = vmatprep.mubr.msk.f32.mxu0 %vm1570_vm4, %v1560_v1 }
 0xbc7   :  { %1951 = vmatmul.mubr.msk.f32.vlgmr.msra.gmra.mrb[10].mxu0 %vm1570_vm4, %v1561_v2 }
 0xc9a   :  { %v1952_v3 = vpop.f32.mrb[10].mxu0 }
 0xc9b   :  { %v1643_v4 = vpop.f32.mrb[11].mxu0  ;;  %v1649_v6 = vadd.f32 %v1952_v3, %v2584_v27 }
 0xc9c   :  { %v1644_v7 = vadd.f32 %v1643_v4, %v2584_v27 }
 0xc9d   :  { %v1653_v11 = vadd.f32 %v1649_v6, %v1470_v58 }
 0xc9e   :  { %v1652_v8 = vadd.f32 %v1644_v7, %v1469_v57 }
 0xc9f   :  { %v1657_v12 = vsel %vm105_vm0, %v1653_v11, 0.0 }
 0xca0   :  { %v1654_v10 = vsel %vm105_vm0, %v1652_v8, 0.0 }
 0xca1   :  { %1655 = vadd.xlane.f32.xlu1 %v1654_v10 }
 0xca5   :  { %1658 = vadd.xlane.f32.xlu1 %v1657_v12 }
 0xd2e   :  { %v1656_v14 = vpop.xlane.xlu1 %1655 }
 0xd2f   :  { %v1660_v16 = vmul.f32 0.03125, %v1656_v14 }
 0xd31   :  { %v1662_v23 = vsub.f32 %v1652_v8, %v1660_v16 }
 0xd32   :  { %v1659_v31 = vpop.xlane.xlu1 %1658 }
 0xd33   :  { %v1661_v17 = vmul.f32 0.03125, %v1659_v31  ;;  %v1664_v9 = vmul.f32 %v1662_v23, %v1662_v23 }
 0xd35   :  { %v1663_v24 = vsub.f32 %v1653_v11, %v1661_v17  ;;  %v1666_v5 = vsel %vm105_vm0, %v1664_v9, 0.0 }
 0xd37   :  { %v1665_v25 = vmul.f32 %v1663_v24, %v1663_v24 }
 0xd39   :  { %v1669_v26 = vsel %vm105_vm0, %v1665_v25, 0.0 }
 0xd3a   :  { %1670 = vadd.xlane.f32.xlu1 %v1669_v26 }
 0xd3e   :  { %1667 = vadd.xlane.f32.xlu1 %v1666_v5 }
 0xd4f   :  { %1681 = vrot.lane.b32.xlu1 %v1468_v54, %s2252_s29  ;;  %s1699_s29 = sshll.u32 %s2259_s7, 4  ;;  %s1700_s29 = int_to_ptr.vmem [resolvable:$true] %s1699_s29 }
 0xd50   :  { %s2216_s14 = scalar_lea.vmem %s1700_s29, 256  ;;  %p2221_p5 = scmp.lt.s32.totalorder %s1700_s29, %s1700_s29 }
 0xd51   :  { %p2217_p4 = scmp.ne.s32.totalorder %s1700_s29, %s2216_s14  ;;  %p2222_p6 = scmp.lt.s32.totalorder %s2216_s14, %s2216_s14 }
 0xd53   :  { %p2223_p7 = por %p2222_p6, %p2221_p5 }
 0xd55   :  { %p2224_p8 = pnand %p2223_p7, %p2217_p4 }
 0xdc7   :  { %v1671_v27 = vpop.xlane.xlu1 %1670 }
 0xdc8   :  { %v1673_v28 = vmul.f32 0.03125, %v1671_v27 }
 0xdca   :  { %v1675_v29 = vadd.f32 1e-05, %v1673_v28 }
 0xdcb   :  { %v1668_v30 = vpop.xlane.xlu1 %1667 }
 0xdcc   :  { %2124 = vrsqrt.f32 %v1675_v29  ;;  %v1672_v32 = vmul.f32 0.03125, %v1668_v30 }
 0xdce   :  { %v1674_v44 = vadd.f32 1e-05, %v1672_v32 }
 0xdcf   :  { %v1682_v38 = vpop.permute.xlu1 %1681 }
 0xdd0   :  { %2126 = vrsqrt.f32 %v1674_v44 }
 0xdd6   :  { %v2125_v36 = vpop.eup %2124 }
 0xdd7   :  { %v1679_v39 = vmul.f32 %v2125_v36, %v1663_v24 }
 0xdd9   :  { %v1685_v41 = vmul.f32 %v1682_v38, %v1679_v39 }
 0xdda   :  { %v2127_v42 = vpop.eup %2126 }
 0xddb   :  { %v1678_v43 = vmul.f32 %v2127_v42, %v1662_v23  ;;  %v1691_v22 = vadd.f32 %v1689_v40, %v1685_v41 }
 0xddd   :  { %v1684_v45 = vmul.f32 %v1682_v38, %v1678_v43  ;;  %1693 = vst.msk [vmem:[#allocation10 + $0x8] sm:$0xff] %vm105_vm0, %v1691_v22 }
 0xddf   :  { %v1690_v34 = vadd.f32 %v1689_v40, %v1684_v45 }
 0xde1   :  { %1692 = vst.msk [vmem:[#allocation10] sm:$0xff] %vm105_vm0, %v1690_v34 }
 0xde2   :  { %2227 = shalt.err (!%p2224_p8)
}
 0xde3   :  { %s2228_s16 = scalar_lea.hbm %s2653_s9, 256 }
 0xde4   :  { %p2229_p9 = scmp.ne.s32.totalorder %s2653_s9, %s2228_s16  ;;  %p2232_p10 = scmp.lt.u32.totalorder %s2228_s16, %s2653_s9 }
 0xde6   :  { %p2234_p11 = pnand %p2232_p10, %p2229_p9 }
 0xde8   :  { %2237 = shalt.err (!%p2234_p11)
}
 0xde9   :  { %1705 = dma.vmem_to_hbm [thread:$0]  %s1700_s29, 256, %s2653_s9, [#allocation4], %s2248_s21, %s2248_s21, %s2249_s22  }
 0xdea   :  { %2244 = dma.done.wait [#allocation4], 256  }
 0xdeb   :  { %2245 = vsyncadd [#allocation4], 4294967040 }
 0xdec   :  { %1709 = vsyncpa [#allocation3], 1 }
 0xded   :  { %1710 = vsyncpa [#allocation6], 1 }
 0xdee   :  { %1711 = vsyncpa [#allocation9], 1 }
 0xdef   :  { %1712 = vsyncpa [#allocation4], 1 }

</bundles_post_ra>
